<compile_context>
chip_gen: v5e
topology: v5e:2x2
jax: 0.10.0
libtpu: 0.0.40
codegen_flags: <defaults>
</compile_context>

<pallas_src>
from functools import partial

import jax
import jax.numpy as jnp
from jax import lax
from jax.experimental import pallas as pl
from jax.experimental.pallas import tpu as pltpu


_LANE = 128  # lane width / MXU alignment for the row tile


def _round_up(a: int, m: int) -> int:
    return (a + m - 1) // m * m


def _att_head_kernel(x_ref, w1_ref, b1_ref, w2_ref, b2_ref, out_ref, *, n_rows):
    """One row-tile of: sigmoid(relu(x @ W1 + b1) @ w2^T + b2).

    x_ref  : (tile_n, L)   streamed (f32 or bf16); last block may be partial
    w1_ref : (L, D)        resident (dtype matches x)
    b1_ref : (1, D)        f32
    w2_ref : (1, D)        f32 (fc2 weight row; n_classes == 1)
    b2_ref : (1,)          f32 scalar in SMEM
    out_ref: (1, tile_n)   lane-dense scores for this row tile (f32)
    """
    tile_n = out_ref.shape[1]

    # fc1 on the MXU with f32 accumulation; bias + ReLU on the VPU in f32.
    h = jnp.dot(x_ref[...], w1_ref[...], preferred_element_type=jnp.float32)
    h = jnp.maximum(h + b1_ref[...], 0.0)

    # fc2 (width 1): contract D of (1, D) x (tile_n, D) -> (1, tile_n).
    # Emitting the row directly keeps the output store lane-dense.
    logits = lax.dot_general(
        w2_ref[...], h,
        dimension_numbers=(((1,), (1,)), ((), ())),
        preferred_element_type=jnp.float32,
    )
    logits = logits + b2_ref[0]

    scores = jax.nn.sigmoid(logits)

    # Mask lanes corresponding to rows past N (ragged last block reads unspecified
    # data); keeps the padded output deterministic.  These lanes are also sliced
    # off in the wrapper.
    row = pl.program_id(0) * tile_n + lax.broadcasted_iota(jnp.int32, (1, tile_n), 1)
    scores = jnp.where(row < n_rows, scores, 0.0)

    out_ref[...] = scores.astype(out_ref.dtype)


def att_head_forward(x, w1, b1, w2, b2, *, tile_n=2048):
    """Pallas forward pass of Att_Head. Returns sigmoid attention scores, shape (N, 1).

    x is streamed in the dtype it arrives in.  For bf16 streaming, cast x at the
    producer (``att_head_forward(x.astype(jnp.bfloat16), ...)``); W1 is cast to match
    inside (it is tiny and resident).  Bias / activations / accumulation stay f32.
    """
    N, L = x.shape
    D = w1.shape[1]
    assert w1.shape == (L, D)

    # Match W1 dtype to x so the MXU sees a homogeneous low-precision matmul when the
    # caller streams x in bf16.  Small weights stay f32 otherwise.
    if x.dtype != jnp.float32:
        w1 = jnp.asarray(w1).astype(x.dtype)
    else:
        w1 = jnp.asarray(w1, jnp.float32)
    b1 = jnp.asarray(b1, jnp.float32).reshape(1, D)
    w2 = jnp.asarray(w2, jnp.float32).reshape(1, D)
    b2 = jnp.asarray(b2, jnp.float32).reshape((1,))

    x_isz = jnp.dtype(x.dtype).itemsize
    w_isz = jnp.dtype(w1.dtype).itemsize

    # ---- row-tile selection --------------------------------------------------
    tile_n = max(_LANE, (int(tile_n) // _LANE) * _LANE)     # lane/MXU aligned
    tile_n = min(tile_n, _round_up(N, _LANE))               # never bigger than needed
    # >= 4 grid steps when there is enough work: 2 TensorCores on v7x shard the
    # "parallel" axis, and each core needs >= 2 steps to pipeline its x DMA.
    if N >= 4 * _LANE:
        tile_n = min(tile_n, _round_up(-(-N // 4), _LANE))

    # VMEM footprint of one pipelined step (double-buffered x tile + f32 h
    # intermediate + W1 + small residents).  Cap the tile so it fits a conservative
    # budget that works on every generation, then tell the compiler explicitly.
    def _footprint(t):
        return (2 * t * L * x_isz        # double-buffered x tile
                + t * D * 4              # h intermediate (f32)
                + 2 * L * D * w_isz      # W1 (conservatively double-buffered)
                + 4 * D * 4              # b1, w2
                + 4 * t * 4)             # logits/scores + (1, t) output blocks

    vmem_budget = 20 << 20
    while tile_n > _LANE and _footprint(tile_n) > vmem_budget:
        tile_n -= _LANE
    vmem_limit = int(min(48 << 20, max(_footprint(tile_n) + (4 << 20), 16 << 20)))

    grid_n = -(-N // tile_n)          # cdiv; last block may be partial (no jnp.pad)
    n_pad = grid_n * tile_n

    cost = pl.CostEstimate(
        flops=2 * N * L * D + 2 * N * D,
        transcendentals=N,  # one exp per row (sigmoid)
        bytes_accessed=(N * L * x_isz
                        + L * D * w_isz
                        + (b1.size + w2.size + b2.size) * 4
                        + n_pad * 4),
    )

    kernel = partial(_att_head_kernel, n_rows=N)

    scores_row = pl.pallas_call(
        kernel,
        out_shape=jax.ShapeDtypeStruct((1, n_pad), jnp.float32),
        grid_spec=pltpu.PrefetchScalarGridSpec(
            num_scalar_prefetch=0,
            grid=(grid_n,),
            in_specs=[
                pl.BlockSpec((tile_n, L), lambda i: (i, 0)),        # x row-tile (streamed)
                pl.BlockSpec((L, D), lambda i: (0, 0)),             # W1 (grid-invariant)
                pl.BlockSpec((1, D), lambda i: (0, 0)),             # b1 (grid-invariant)
                pl.BlockSpec((1, D), lambda i: (0, 0)),             # W2 row (grid-invariant)
                pl.BlockSpec(memory_space=pltpu.MemorySpace.SMEM),  # b2 scalar in SMEM
            ],
            out_specs=pl.BlockSpec((1, tile_n), lambda i: (0, i)),  # lane-dense scores
        ),
        compiler_params=pltpu.CompilerParams(
            dimension_semantics=("parallel",),
            vmem_limit_bytes=vmem_limit,
        ),
        cost_estimate=cost,
    )(x, w1, b1, w2, b2)

    # Lane-dense (1, N_pad) -> (N, 1), dropping the masked tail lanes.
    return scores_row[0, :N].reshape(N, 1)


if __name__ == "__main__":
    # Small shapes consistent with the module: FEATURE_DIM -> ATT_IM_DIM -> 1.
    N, FEATURE_DIM, ATT_IM_DIM = 1000, 256, 128   # N intentionally not a tile multiple

    key = jax.random.PRNGKey(0)
    kx, k1, k2, k3, k4 = jax.random.split(key, 5)
    x = jax.random.normal(kx, (N, FEATURE_DIM), jnp.float32)
    # Weights stored (in, out) = transpose of torch nn.Linear's (out, in) layout.
    w1 = jax.random.normal(k1, (FEATURE_DIM, ATT_IM_DIM), jnp.float32) / jnp.sqrt(FEATURE_DIM)
    b1 = jax.random.normal(k2, (1, ATT_IM_DIM), jnp.float32) * 0.01
    w2 = jax.random.normal(k3, (1, ATT_IM_DIM), jnp.float32) / jnp.sqrt(ATT_IM_DIM)
    b2 = jax.random.normal(k4, (1,), jnp.float32) * 0.01

    # Reference: fc1 -> ReLU -> fc2 -> Sigmoid (identical math to the torch module).
    h_ref = jnp.maximum(
        jnp.dot(x, w1, precision=lax.Precision.HIGHEST) + b1, 0.0)
    logits_ref = jnp.dot(h_ref, w2.T, precision=lax.Precision.HIGHEST) + b2
    a_ref = 1.0 / (1.0 + jnp.exp(-logits_ref))            # (N, 1)

    # f32 path (tight tolerance).
    a = att_head_forward(x, w1, b1, w2, b2)
    jax.block_until_ready(a)
    assert a.shape == (N, 1)
    assert jnp.allclose(a, a_ref, atol=2e-4, rtol=2e-4), float(jnp.max(jnp.abs(a - a_ref)))

    # bf16 streaming path: cast at the producer (once), not inside the wrapper.
    x_bf16 = x.astype(jnp.bfloat16)
    a_bf16 = att_head_forward(x_bf16, w1, b1, w2, b2)
    jax.block_until_ready(a_bf16)
    assert a_bf16.shape == (N, 1)
    assert jnp.allclose(a_bf16, a_ref, atol=5e-2, rtol=5e-2)

    print("KERNEL_OK")
</pallas_src>

<mosaic_0001>
module attributes {stable_mosaic.version = 11 : i64} {
  func.func @_att_head_kernel(%arg0: i32, %arg1: memref<256x256xf32, #tpu.memory_space<vmem>>, %arg2: memref<256x128xf32, #tpu.memory_space<vmem>>, %arg3: memref<1x128xf32, #tpu.memory_space<vmem>>, %arg4: memref<1x128xf32, #tpu.memory_space<vmem>>, %arg5: memref<1xf32, #tpu.memory_space<smem>>, %arg6: memref<1x256xf32, #tpu.memory_space<vmem>>) attributes {dimension_semantics = [#tpu.dimension_semantics<parallel>], iteration_bounds = array<i64: 4>, scalar_prefetch = 0 : i64, scratch_operands = 0 : i64, tpu.core_type = #tpu.core_type<tc>, window_params = [{transform_indices = @transform_0, window_bounds = array<i64: 256, 256>}, {pipeline_mode = #tpu.pipeline_mode<synchronous>, transform_indices = @transform_1, window_bounds = array<i64: 256, 128>}, {pipeline_mode = #tpu.pipeline_mode<synchronous>, transform_indices = @transform_2, window_bounds = array<i64: 1, 128>}, {pipeline_mode = #tpu.pipeline_mode<synchronous>, transform_indices = @transform_3, window_bounds = array<i64: 1, 128>}, {transform_indices = @transform_4, window_bounds = array<i64: 1>}, {transform_indices = @transform_5, window_bounds = array<i64: 1, 256>}]} {
    %c0 = arith.constant 0 : index
    %c0_0 = arith.constant 0 : index
    %0 = vector.load %arg1[%c0, %c0_0] : memref<256x256xf32, #tpu.memory_space<vmem>>, vector<256x256xf32>
    %c0_1 = arith.constant 0 : index
    %c0_2 = arith.constant 0 : index
    %1 = vector.load %arg2[%c0_1, %c0_2] : memref<256x128xf32, #tpu.memory_space<vmem>>, vector<256x128xf32>
    %cst = arith.constant dense<0.000000e+00> : vector<256x128xf32>
    %2 = tpu.matmul %0, %1, %cst {dimension_numbers = #tpu.dot_dimension_numbers<[1], [0], [0], [1], [0, 0, 1, 1], [], []>} : vector<256x256xf32>, vector<256x128xf32>, vector<256x128xf32> -> vector<256x128xf32>
    %c0_3 = arith.constant 0 : index
    %c0_4 = arith.constant 0 : index
    %3 = vector.load %arg3[%c0_3, %c0_4] : memref<1x128xf32, #tpu.memory_space<vmem>>, vector<1x128xf32>
    %4 = vector.broadcast %3 : vector<1x128xf32> to vector<256x128xf32>
    %5 = arith.addf %2, %4 : vector<256x128xf32>
    %cst_5 = arith.constant 0.000000e+00 : f32
    %6 = vector.broadcast %cst_5 : f32 to vector<256x128xf32>
    %7 = arith.maximumf %5, %6 : vector<256x128xf32>
    %c0_6 = arith.constant 0 : index
    %c0_7 = arith.constant 0 : index
    %8 = vector.load %arg4[%c0_6, %c0_7] : memref<1x128xf32, #tpu.memory_space<vmem>>, vector<1x128xf32>
    %cst_8 = arith.constant dense<0.000000e+00> : vector<1x256xf32>
    %9 = tpu.matmul %8, %7, %cst_8 {dimension_numbers = #tpu.dot_dimension_numbers<[1], [1], [0], [0], [0, 0, 1, 0], [], []>} : vector<1x128xf32>, vector<256x128xf32>, vector<1x256xf32> -> vector<1x256xf32>
    %c0_9 = arith.constant 0 : index
    %10 = memref.load %arg5[%c0_9] : memref<1xf32, #tpu.memory_space<smem>>
    %11 = vector.broadcast %10 : f32 to vector<1x256xf32>
    %12 = arith.addf %9, %11 : vector<1x256xf32>
    %13 = arith.negf %12 : vector<1x256xf32>
    %14 = math.exp %13 : vector<1x256xf32>
    %cst_10 = arith.constant 1.000000e+00 : f32
    %15 = vector.broadcast %cst_10 : f32 to vector<1x256xf32>
    %16 = arith.addf %15, %14 : vector<1x256xf32>
    %17 = arith.divf %15, %16 : vector<1x256xf32>
    %c256_i32 = arith.constant 256 : i32
    %18 = arith.muli %arg0, %c256_i32 : i32
    %19 = tpu.iota {dimensions = array<i32: 1>} : vector<1x256xi32>
    %20 = vector.broadcast %18 : i32 to vector<1x256xi32>
    %21 = arith.addi %20, %19 : vector<1x256xi32>
    %c1000_i32 = arith.constant 1000 : i32
    %22 = vector.broadcast %c1000_i32 : i32 to vector<1x256xi32>
    %23 = arith.cmpi slt, %21, %22 : vector<1x256xi32>
    %cst_11 = arith.constant 0.000000e+00 : f32
    %24 = vector.broadcast %cst_11 : f32 to vector<1x256xf32>
    %25 = arith.select %23, %17, %24 : vector<1x256xi1>, vector<1x256xf32>
    %c0_12 = arith.constant 0 : index
    %c0_13 = arith.constant 0 : index
    %26 = vector.load %arg6[%c0_12, %c0_13] : memref<1x256xf32, #tpu.memory_space<vmem>>, vector<1x256xf32>
    tpu.vector_store %arg6[%c0_12, %c0_13], %25 {strides = array<i32>} : memref<1x256xf32, #tpu.memory_space<vmem>>, vector<1x256xf32>,
    return
  }
  func.func @transform_0(%arg0: i32) -> (i32, i32) {
    %c0_i32 = arith.constant 0 : i32
    %c0_i32_0 = arith.constant 0 : i32
    return %arg0, %c0_i32 : i32, i32
  }
  func.func @transform_1(%arg0: i32) -> (i32, i32) {
    %c0_i32 = arith.constant 0 : i32
    %c0_i32_0 = arith.constant 0 : i32
    %c0_i32_1 = arith.constant 0 : i32
    return %c0_i32, %c0_i32_0 : i32, i32
  }
  func.func @transform_2(%arg0: i32) -> (i32, i32) {
    %c0_i32 = arith.constant 0 : i32
    %c0_i32_0 = arith.constant 0 : i32
    %c0_i32_1 = arith.constant 0 : i32
    return %c0_i32, %c0_i32_0 : i32, i32
  }
  func.func @transform_3(%arg0: i32) -> (i32, i32) {
    %c0_i32 = arith.constant 0 : i32
    %c0_i32_0 = arith.constant 0 : i32
    %c0_i32_1 = arith.constant 0 : i32
    return %c0_i32, %c0_i32_0 : i32, i32
  }
  func.func @transform_4(%arg0: i32) -> i32 {
    %c0_i32 = arith.constant 0 : i32
    %c0_i32_0 = arith.constant 0 : i32
    return %c0_i32 : i32
  }
  func.func @transform_5(%arg0: i32) -> (i32, i32) {
    %c0_i32 = arith.constant 0 : i32
    %c0_i32_0 = arith.constant 0 : i32
    return %c0_i32, %arg0 : i32, i32
  }
}

</mosaic_0001>

<bundles_post_ra>
// kernel: tpu_custom_call.1
= control target key start
LH: loop header
LB: loop body
LE: loop exit
PB: predicated region body
PF: predicated region fallthrough
CT: control target
= control target key end

     0   :  { %s1470_s0 = inlined_call_operand.hbm [shape: f32[1000,256], index: 0, kind: input, shape index: {}]   ;;  %s1471_s1 = inlined_call_operand.hbm [shape: f32[256,128], index: 1, kind: input, shape index: {}]   ;;  %s1472_s2 = inlined_call_operand.vmem [shape: f32[1,128], index: 2, kind: input, shape index: {}]   ;;  %s1473_s3 = inlined_call_operand.vmem [shape: f32[1,128], index: 3, kind: input, shape index: {}]   ;;  %s1474_s4 = inlined_call_operand.<no memory space> [shape: f32[1], index: 4, kind: input, shape index: {}]   ;;  %s1475_s5 = inlined_call_operand.hbm [shape: f32[1,1024], index: 5, kind: output, shape index: {}]  }
   0x1   :  { %10 = sst [smem:[#allocation2]] %s1474_s4 }
   0x2   :  { %11 = vsyncpa [#allocation4], 0 }
   0x3   :  { %13 = vsyncpa [#allocation4 + $0x1], 0 }
   0x4   :  { %14 = vsyncpa [#allocation7], 0 }
   0x5   :  { %15 = vsyncpa [#allocation5], 0 }
   0x6   :  { %17 = vsyncpa [#allocation5 + $0x1], 0  ;;  %s1139_s20 = smov 0   ;;  %s1141_s21 = smov 0  }
   0x7   :  { %s1143_s22 = smov 0   ;;  %s1145_s23 = smov 0  }
   0x8 LB: > { %s1160_s4 = sadd.s32 4294967295, %s1098_s23   ;;  %s836_s24 = sadd.s32 4294967294, %s1098_s23   ;;  %s1098_s23 = sphi %s1145_s23, %s1491_s23   ;;  %s1094_s22 = sphi %s1143_s22, %s1490_s22   ;;  %s1090_s21 = sphi %s1141_s21, %s1489_s21   ;;  %s1086_s20 = sphi %s1139_s20, %s1488_s20  }
   0x9   : > { %s1164_s25 = sadd.s32 1, %s1098_s23   ;;  %s30_s26 = sadd.s32 1, %s1094_s22 }
   0xa   : > { %s27_s27 = ssub.s32 %s1098_s23, %s1164_s25  ;;  %p37_p0 = scmp.ne.s32.totalorder %s1094_s22, %s1090_s21 }
   0xb   : > { %p28_p1 = scmp.eq.s32.totalorder %s27_s27, 0  ;;  %p38_p2 = scmp.eq.s32.totalorder %s1098_s23, 0 }
   0xc   : > { %p43_p3 = scmp.ne.s32.totalorder %s1090_s21, %s1086_s20  ;;  %p1477_p4 = scmp.eq.s32.totalorder %s1160_s4, 0 }
   0xd   : > { %s1176_s28 = scalar_select %p28_p1, %s1094_s22, %s30_s26  }
   0xe   : > { %p1178_p5 = por %p38_p2, %p37_p0  ;;  %p1184_p6 = por %p1477_p4, %p43_p3 }
   0xf   : > { %p151_p7 = scmp.eq.s32.totalorder %s1160_s4, 3  ;;  %p157_p8 = scmp.eq.s32.totalorder %s836_s24, 3 }
  0x10   : > { %p837_p9 = scmp.ge.s32.totalorder %s1098_s23, 1  ;;  %p164_p10 = scmp.lt.s32.totalorder %s1098_s23, 5 }
  0x11   : > { %p1191_p11 = por %p151_p7, %p37_p0  ;;  %p1195_p12 = por %p157_p8, %p43_p3 }
  0x12   : > { %p1199_p13 = pnand %p837_p9, %p164_p10  ;;  %s175_s11 = sshll.u32 %s1471_s1, 4  ;;  %s176_s11 = int_to_ptr.hbm [resolvable:$true] %s175_s11 }
  0x13   : > { %s1481_s7 = scalar_select %p1195_p12, 1, 0 }
  0x14   : > { %p902_p1 = pneg %p1199_p13  ;;  %s1100_s12 = smov [#allocation6]  }
  0x15   : > { %s177_s13 = sshll.u32 %s1100_s12, 4  ;;  %s1101_s14 = smov 128   ;;  %s178_s13 = int_to_ptr.vmem [resolvable:$true] %s177_s13 }
  0x16   : > { %p903_p0 = pnand %p902_p1, %p1477_p4  ;;  %s1102_s15 = smov 8  }
  0x17   : > { %p839_p2 = scmp.ge.s32.totalorder %s1098_s23, 4 }
  0x18   : > { %905 = dma.hbm_to_vmem [thread:$0]  (!%p903_p0), %s176_s11, 4096, %s178_s13, [#allocation7], %s1101_s14, %s1101_s14, %s1102_s15  }
  0x19   : > { %196 = sbr.rel (%p839_p2) target bundleno = 67 (0x43), region = 32 }
  0x1e   : > { %199 = sbr.rel (!%p1178_p5) target bundleno = 67 (0x43), region = 36  ;;  %s200_s16 = sand.u32 (%p1178_p5), 1, %s1094_s22  }
  0x1f   : > { %s841_s17 = sshll.u32 (%p1178_p5), %s1098_s23, 5  ;;  %s840_s18 = sshll.u32 (%p1178_p5), %s200_s16, 9 }
  0x20   : > { %s206_s19 = ssub.s32 (%p1178_p5), 125, %s841_s17  ;;  %s1218_s9 = scalar_lea.sflag (%p1178_p5), [#allocation4], %s200_s16 }
  0x21   : > { %p207_p3 = scmp.lt.s32.totalorder (%p1178_p5), %s206_s19, 32  ;;  %s204_s10 = scalar_lea.vmem (%p1178_p5), [#allocation3], %s840_s18 }
  0x23   : > { %s1493_s19 = smov (!%p207_p3, %s206_s19), 32 }
  0x24   : > { %s860_s24 = sshll.u32 %s1493_s19, 4 }
  0x25   : > { %s211_s26 = ssub.s32 512, %s860_s24 }
  0x26   : > { %s212_s27 = sshll.u32 %s211_s26, 4 }
  0x27   : > { %213 = vsyncadd %s1218_s9, %s212_s27  ;;  %p1221_p5 = scmp.ne.s32.totalorder %s860_s24, 0  ;;  %s862_s11 = sshll.u32 %s1098_s23, 9 }
  0x28   : > { %s217_s14 = scalar_lea.hbm %s1470_s0, %s862_s11  ;;  %s1229_s15 = sshll.u32 %s204_s10, 4  ;;  %s222_s15 = int_to_ptr.vmem [resolvable:$true] %s1229_s15 }
  0x29   : > { %s219_s16 = sshll.u32 %s217_s14, 4  ;;  %s1476_s17 = sshll.u32 %s1493_s19, 8  ;;  %s1232_s16 = int_to_ptr.hbm [resolvable:$true] %s219_s16 }
  0x2a   : > { %s989_s18 = sshra.s32 %s1232_s16, 4  ;;  %s991_s24 = sshrl.u32 %s1476_s17, 4  ;;  %s990_s18 = int_to_ptr.hbm [resolvable:$true] %s989_s18 }
  0x2b   : > { %s996_s26 = scalar_lea.hbm %s990_s18, %s991_s24  ;;  %s1000_s10 = scalar_lea.hbm %s1470_s0, 2000 }
  0x2c   : > { %p997_p7 = scmp.ne.s32.totalorder %s990_s18, %s996_s26  ;;  %p1001_p10 = scmp.lt.s32.totalorder %s990_s18, %s1470_s0 }
  0x2d   : > { %p1002_p1 = scmp.lt.s32.totalorder %s1000_s10, %s996_s26 }
  0x2e   : > { %p998_p8 = pnand %p997_p7, %p1221_p5 }
  0x2f   : > { %p1003_p0 = por %p1002_p1, %p1001_p10 }
  0x30   : > { %p999_p9 = pneg %p998_p8 }
  0x32   : > { %p1004_p2 = pnand %p1003_p0, %p999_p9 }
  0x34   : > { %1007 = shalt.err (!%p1004_p2)
}
  0x35   : > { %s1008_s14 = sshra.s32 %s222_s15, 4  ;;  %s1103_s27 = smov [#allocation3]   ;;  %s1009_s14 = int_to_ptr.vmem [resolvable:$true] %s1008_s14 }
  0x36   : > { %s1015_s17 = scalar_lea.vmem %s1009_s14, %s991_s24  ;;  %s1019_s11 = scalar_lea.vmem %s1103_s27, 1024 }
  0x37   : > { %p1016_p3 = scmp.ne.s32.totalorder %s1009_s14, %s1015_s17  ;;  %p1021_p4 = scmp.lt.s32.totalorder %s1019_s11, %s1015_s17 }
  0x39   : > { %p1017_p7 = pnand %p1016_p3, %p1221_p5 }
  0x3b   : > { %p1018_p8 = pneg %p1017_p7 }
  0x3d   : > { %p1023_p12 = pnand %p1021_p4, %p1018_p8 }
  0x3f   : > { %1026 = shalt.err (!%p1023_p12)
}
  0x40   : > { %s1104_s18 = smov 256   ;;  %s1105_s26 = smov 16  }
  0x41   : > { %s1484_s10 = sshll.u32 %s1493_s19, 8 }
  0x42   : > { %227 = dma.hbm_to_vmem [thread:$0]  (%p1221_p5), %s1232_s16, %s1484_s10, %s222_s15, %s1218_s9, %s1104_s18, %s1104_s18, %s1105_s26  }
  0x43 PF: > { %233 = sbr.rel (%p1199_p13) target bundleno = 590 (0x24e), region = 40  ;;  %s1261_s17 = sand.u32 (!%p1199_p13), 1, %s1090_s21  }
  0x44   : > { %s850_s24 = sshll.u32 (!%p1199_p13), %s1261_s17, 9  ;;  %s236_s12 = scalar_lea.sflag (!%p1199_p13), [#allocation4], %s1261_s17 }
  0x45   : > { %s1265_s13 = scalar_lea.vmem (!%p1199_p13), [#allocation3], %s850_s24 }
  0x48   : > { %1073 = dma.done.wait (%p1184_p6), %s236_s12, 8192  }
  0x49   : > { %1075 = vsyncadd (%p1184_p6), %s236_s12, 4294959104  ;;  %p1485_p4 = scmp.eq.s32.totalorder %s1160_s4, 0 }
  0x4b   : > { %1077 = dma.done.wait (%p1485_p4), [#allocation7], 4096   ;;  %p1486_p12 = pmov %p1485_p4 }
  0x4c   : > { %v358_v0 = vld [vmem:[#allocation6 + $0x78] sm:$0xff]  ;;  %v357_v2 = vld [vmem:[#allocation6 + $0x70] sm:$0xff]  ;;  %v356_v4 = vld [vmem:[#allocation6 + $0x68] sm:$0xff]  ;;  %s638_s29 = sld [smem:[#allocation2]]  ;;  %s855_s15 = sshll.u32 %s1160_s4, 8  ;;  %vm732_vm10 = vcmask 1040384  }
  0x4d   : > { %1079 = vsyncadd (%p1486_p12), [#allocation7], 4294963200  ;;  %v374_v1 = vld [vmem:[#allocation6 + $0xf8] sm:$0xff]  ;;  %379 = vmatpush.msra.mxu0 %v358_v0  ;;  %v373_v3 = vld [vmem:[#allocation6 + $0xf0] sm:$0xff]  ;;  %863 = vmatpush.msra.mxu2 %v358_v0  ;;  %s852_s16 = sshll.u32 %s1261_s17, 1  ;;  %s857_s14 = sshll.u32 %s1160_s4, 1 }
  0x4e   : > { %879 = vmatpush.msra.mxu3 %v374_v1  ;;  %492 = vmatpush.msra.mxu1 %v374_v1  ;;  %v372_v5 = vld [vmem:[#allocation6 + $0xe8] sm:$0xff]  ;;  %v355_v6 = vld [vmem:[#allocation6 + $0x60] sm:$0xff]  ;;  %v354_v8 = vld [vmem:[#allocation6 + $0x58] sm:$0xff]  ;;  %s751_s18 = scalar_lea.hbm %s1475_s5, %s857_s14  ;;  %s271_s4 = scalar_lea.vmem [#allocation8], %s852_s16 }
  0x4f   : > { %380 = vmatpush.msra.mxu0 %v357_v2  ;;  %v371_v7 = vld [vmem:[#allocation6 + $0xe0] sm:$0xff]  ;;  %864 = vmatpush.msra.mxu2 %v357_v2  ;;  %v370_v9 = vld [vmem:[#allocation6 + $0xd8] sm:$0xff]  ;;  %v353_v10 = vld [vmem:[#allocation6 + $0x50] sm:$0xff]  ;;  %s753_s26 = sshll.u32 %s271_s4, 4  ;;  %s755_s10 = sshll.u32 %s751_s18, 4  ;;  %s754_s26 = int_to_ptr.vmem [resolvable:$true] %s753_s26  ;;  %s756_s10 = int_to_ptr.hbm [resolvable:$true] %s755_s10 }
  0x50   : > { %880 = vmatpush.msra.mxu3 %v373_v3  ;;  %493 = vmatpush.msra.mxu1 %v373_v3  ;;  %v369_v11 = vld [vmem:[#allocation6 + $0xd0] sm:$0xff]  ;;  %v352_v12 = vld [vmem:[#allocation6 + $0x48] sm:$0xff]  ;;  %v351_v14 = vld [vmem:[#allocation6 + $0x40] sm:$0xff]  ;;  %s741_s24 = scalar_lea.sflag [#allocation5], %s1261_s17  ;;  %s1042_s12 = sshra.s32 %s756_s10, 4  ;;  %s1043_s12 = int_to_ptr.hbm [resolvable:$true] %s1042_s12 }
  0x51   : > { %381 = vmatpush.msra.mxu0 %v356_v4  ;;  %865 = vmatpush.msra.mxu2 %v356_v4  ;;  %v368_v13 = vld [vmem:[#allocation6 + $0xc8] sm:$0xff]  ;;  %v367_v15 = vld [vmem:[#allocation6 + $0xc0] sm:$0xff]  ;;  %v350_v16 = vld [vmem:[#allocation6 + $0x38] sm:$0xff]  ;;  %s1048_s19 = scalar_lea.hbm %s1475_s5, 8  ;;  %p1049_p9 = scmp.lt.s32.totalorder %s1043_s12, %s1475_s5 }
  0x52   : > { %881 = vmatpush.msra.mxu3 %v372_v5  ;;  %494 = vmatpush.msra.mxu1 %v372_v5  ;;  %v366_v17 = vld [vmem:[#allocation6 + $0xb8] sm:$0xff]  ;;  %v349_v18 = vld [vmem:[#allocation6 + $0x30] sm:$0xff]  ;;  %v348_v20 = vld [vmem:[#allocation6 + $0x28] sm:$0xff] }
  0x53   : > { %382 = vmatpush.msra.mxu0 %v355_v6  ;;  %866 = vmatpush.msra.mxu2 %v355_v6  ;;  %v365_v19 = vld [vmem:[#allocation6 + $0xb0] sm:$0xff]  ;;  %v364_v21 = vld [vmem:[#allocation6 + $0xa8] sm:$0xff]  ;;  %v347_v22 = vld [vmem:[#allocation6 + $0x20] sm:$0xff] }
  0x54   : > { %882 = vmatpush.msra.mxu3 %v371_v7  ;;  %495 = vmatpush.msra.mxu1 %v371_v7  ;;  %v363_v23 = vld [vmem:[#allocation6 + $0xa0] sm:$0xff]  ;;  %v346_v24 = vld [vmem:[#allocation6 + $0x18] sm:$0xff]  ;;  %v345_v26 = vld [vmem:[#allocation6 + $0x10] sm:$0xff] }
  0x55   : > { %383 = vmatpush.msra.mxu0 %v354_v8  ;;  %867 = vmatpush.msra.mxu2 %v354_v8  ;;  %v362_v25 = vld [vmem:[#allocation6 + $0x98] sm:$0xff]  ;;  %v361_v27 = vld [vmem:[#allocation6 + $0x90] sm:$0xff]  ;;  %v344_v28 = vld [vmem:[#allocation6 + $0x8] sm:$0xff] }
  0x56   : > { %883 = vmatpush.msra.mxu3 %v370_v9  ;;  %496 = vmatpush.msra.mxu1 %v370_v9  ;;  %v360_v29 = vld [vmem:[#allocation6 + $0x88] sm:$0xff]  ;;  %v343_v30 = vld [vmem:[#allocation6] sm:$0xff]  ;;  %v314_v33 = vld [vmem:[%s1265_s13 + $0x118] sm:$0xff] }
  0x57   : > { %384 = vmatpush.msra.mxu0 %v353_v10  ;;  %868 = vmatpush.msra.mxu2 %v353_v10  ;;  %v359_v31 = vld [vmem:[#allocation6 + $0x80] sm:$0xff]  ;;  %v280_v34 = vld [vmem:[%s1265_s13 + $0x8] sm:$0xff]  ;;  %v281_v36 = vld [vmem:[%s1265_s13 + $0x10] sm:$0xff] }
  0x58   : > { %884 = vmatpush.msra.mxu3 %v369_v11  ;;  %497 = vmatpush.msra.mxu1 %v369_v11  ;;  %v279_v32 = vld [vmem:[%s1265_s13] sm:$0xff]  ;;  %v316_v37 = vld [vmem:[%s1265_s13 + $0x128] sm:$0xff]  ;;  %v282_v38 = vld [vmem:[%s1265_s13 + $0x18] sm:$0xff] }
  0x59   : > { %385 = vmatpush.msra.mxu0 %v352_v12  ;;  %869 = vmatpush.msra.mxu2 %v352_v12  ;;  %v315_v35 = vld [vmem:[%s1265_s13 + $0x120] sm:$0xff]  ;;  %v317_v39 = vld [vmem:[%s1265_s13 + $0x130] sm:$0xff]  ;;  %v318_v41 = vld [vmem:[%s1265_s13 + $0x138] sm:$0xff] }
  0x5a   : > { %885 = vmatpush.msra.mxu3 %v368_v13  ;;  %498 = vmatpush.msra.mxu1 %v368_v13  ;;  %v283_v40 = vld [vmem:[%s1265_s13 + $0x20] sm:$0xff]  ;;  %v284_v42 = vld [vmem:[%s1265_s13 + $0x28] sm:$0xff]  ;;  %v285_v44 = vld [vmem:[%s1265_s13 + $0x30] sm:$0xff] }
  0x5b   : > { %386 = vmatpush.msra.mxu0 %v351_v14  ;;  %870 = vmatpush.msra.mxu2 %v351_v14  ;;  %v319_v43 = vld [vmem:[%s1265_s13 + $0x140] sm:$0xff]  ;;  %v320_v45 = vld [vmem:[%s1265_s13 + $0x148] sm:$0xff]  ;;  %v286_v46 = vld [vmem:[%s1265_s13 + $0x38] sm:$0xff] }
  0x5c   : > { %886 = vmatpush.msra.mxu3 %v367_v15  ;;  %499 = vmatpush.msra.mxu1 %v367_v15  ;;  %v321_v47 = vld [vmem:[%s1265_s13 + $0x150] sm:$0xff]  ;;  %v287_v48 = vld [vmem:[%s1265_s13 + $0x40] sm:$0xff]  ;;  %v322_v49 = vld [vmem:[%s1265_s13 + $0x158] sm:$0xff] }
  0x5d   : > { %387 = vmatpush.msra.mxu0 %v350_v16  ;;  %871 = vmatpush.msra.mxu2 %v350_v16  ;;  %v288_v50 = vld [vmem:[%s1265_s13 + $0x48] sm:$0xff]  ;;  %v323_v51 = vld [vmem:[%s1265_s13 + $0x160] sm:$0xff]  ;;  %v289_v52 = vld [vmem:[%s1265_s13 + $0x50] sm:$0xff] }
  0x5e   : > { %887 = vmatpush.msra.mxu3 %v366_v17  ;;  %500 = vmatpush.msra.mxu1 %v366_v17  ;;  %v324_v53 = vld [vmem:[%s1265_s13 + $0x168] sm:$0xff]  ;;  %v290_v54 = vld [vmem:[%s1265_s13 + $0x58] sm:$0xff]  ;;  %v325_v55 = vld [vmem:[%s1265_s13 + $0x170] sm:$0xff] }
  0x5f   : > { %388 = vmatpush.msra.mxu0 %v349_v18  ;;  %872 = vmatpush.msra.mxu2 %v349_v18  ;;  %v291_v56 = vld [vmem:[%s1265_s13 + $0x60] sm:$0xff]  ;;  %v326_v57 = vld [vmem:[%s1265_s13 + $0x178] sm:$0xff]  ;;  %v292_v58 = vld [vmem:[%s1265_s13 + $0x68] sm:$0xff] }
  0x60   : > { %888 = vmatpush.msra.mxu3 %v365_v19  ;;  %501 = vmatpush.msra.mxu1 %v365_v19  ;;  %v327_v59 = vld [vmem:[%s1265_s13 + $0x180] sm:$0xff]  ;;  %v293_v60 = vld [vmem:[%s1265_s13 + $0x70] sm:$0xff]  ;;  %v328_v61 = vld [vmem:[%s1265_s13 + $0x188] sm:$0xff] }
  0x61   : > { %389 = vmatpush.msra.mxu0 %v348_v20  ;;  %873 = vmatpush.msra.mxu2 %v348_v20  ;;  %v294_v62 = vld [vmem:[%s1265_s13 + $0x78] sm:$0xff]  ;;  %v329_v63 = vld [vmem:[%s1265_s13 + $0x190] sm:$0xff]  ;;  %v295_v0 = vld [vmem:[%s1265_s13 + $0x80] sm:$0xff] }
  0x62   : > { %889 = vmatpush.msra.mxu3 %v364_v21  ;;  %502 = vmatpush.msra.mxu1 %v364_v21  ;;  %v330_v1 = vld [vmem:[%s1265_s13 + $0x198] sm:$0xff]  ;;  %v296_v2 = vld [vmem:[%s1265_s13 + $0x88] sm:$0xff]  ;;  %v331_v3 = vld [vmem:[%s1265_s13 + $0x1a0] sm:$0xff] }
  0x63   : > { %390 = vmatpush.msra.mxu0 %v347_v22  ;;  %874 = vmatpush.msra.mxu2 %v347_v22  ;;  %v297_v4 = vld [vmem:[%s1265_s13 + $0x90] sm:$0xff]  ;;  %v332_v5 = vld [vmem:[%s1265_s13 + $0x1a8] sm:$0xff]  ;;  %v298_v6 = vld [vmem:[%s1265_s13 + $0x98] sm:$0xff] }
  0x64   : > { %890 = vmatpush.msra.mxu3 %v363_v23  ;;  %503 = vmatpush.msra.mxu1 %v363_v23  ;;  %v333_v7 = vld [vmem:[%s1265_s13 + $0x1b0] sm:$0xff]  ;;  %v299_v8 = vld [vmem:[%s1265_s13 + $0xa0] sm:$0xff]  ;;  %v334_v9 = vld [vmem:[%s1265_s13 + $0x1b8] sm:$0xff] }
  0x65   : > { %391 = vmatpush.msra.mxu0 %v346_v24  ;;  %875 = vmatpush.msra.mxu2 %v346_v24  ;;  %v300_v10 = vld [vmem:[%s1265_s13 + $0xa8] sm:$0xff]  ;;  %v335_v11 = vld [vmem:[%s1265_s13 + $0x1c0] sm:$0xff]  ;;  %v301_v12 = vld [vmem:[%s1265_s13 + $0xb0] sm:$0xff] }
  0x66   : > { %891 = vmatpush.msra.mxu3 %v362_v25  ;;  %504 = vmatpush.msra.mxu1 %v362_v25  ;;  %v336_v13 = vld [vmem:[%s1265_s13 + $0x1c8] sm:$0xff]  ;;  %v302_v14 = vld [vmem:[%s1265_s13 + $0xb8] sm:$0xff]  ;;  %v337_v15 = vld [vmem:[%s1265_s13 + $0x1d0] sm:$0xff] }
  0x67   : > { %392 = vmatpush.msra.mxu0 %v345_v26  ;;  %876 = vmatpush.msra.mxu2 %v345_v26  ;;  %v303_v16 = vld [vmem:[%s1265_s13 + $0xc0] sm:$0xff]  ;;  %v338_v17 = vld [vmem:[%s1265_s13 + $0x1d8] sm:$0xff]  ;;  %v304_v18 = vld [vmem:[%s1265_s13 + $0xc8] sm:$0xff] }
  0x68   : > { %892 = vmatpush.msra.mxu3 %v361_v27  ;;  %505 = vmatpush.msra.mxu1 %v361_v27  ;;  %v339_v19 = vld [vmem:[%s1265_s13 + $0x1e0] sm:$0xff]  ;;  %v305_v20 = vld [vmem:[%s1265_s13 + $0xd0] sm:$0xff]  ;;  %v340_v21 = vld [vmem:[%s1265_s13 + $0x1e8] sm:$0xff] }
  0x69   : > { %393 = vmatpush.msra.mxu0 %v344_v28  ;;  %877 = vmatpush.msra.mxu2 %v344_v28  ;;  %v306_v22 = vld [vmem:[%s1265_s13 + $0xd8] sm:$0xff]  ;;  %v341_v23 = vld [vmem:[%s1265_s13 + $0x1f0] sm:$0xff]  ;;  %v307_v24 = vld [vmem:[%s1265_s13 + $0xe0] sm:$0xff] }
  0x6a   : > { %893 = vmatpush.msra.mxu3 %v360_v29  ;;  %506 = vmatpush.msra.mxu1 %v360_v29  ;;  %v342_v25 = vld [vmem:[%s1265_s13 + $0x1f8] sm:$0xff]  ;;  %v308_v26 = vld [vmem:[%s1265_s13 + $0xe8] sm:$0xff]  ;;  %v309_v27 = vld [vmem:[%s1265_s13 + $0xf0] sm:$0xff] }
  0x6b   : > { %394 = vmatpush.msra.mxu0 %v343_v30  ;;  %878 = vmatpush.msra.mxu2 %v343_v30  ;;  %v310_v28 = vld [vmem:[%s1265_s13 + $0xf8] sm:$0xff]  ;;  %v1339_v29 = vld [vmem:[%s1472_s2] ss:$0 sm:$0xff] }
  0x6c   : > { %894 = vmatpush.msra.mxu3 %v359_v31  ;;  %395 = vmatmul.f32.vlgmr.msra.gmra.mxu0 %v279_v32 }
  0x6d   : > { %559 = vmatmul.f32.vlgmr.msra.gmra.mxu3 %v314_v33  ;;  %507 = vmatpush.msra.mxu1 %v359_v31  ;;  %v311_v31 = vld [vmem:[%s1265_s13 + $0x100] sm:$0xff] }
  0x6e   : > { %508 = vmatmul.f32.vlgmr.msra.gmra.mxu1 %v280_v34  ;;  %449 = vmatmul.f32.vlgmr.msra.gmra.mxu2 %v315_v35 }
  0x74   : > { %398 = vmatmul.f32.gmra.mxu0 %v281_v36 }
  0x75   : > { %562 = vmatmul.f32.gmra.mxu3 %v316_v37  ;;  %v313_v37 = vld [vmem:[%s1265_s13 + $0x110] sm:$0xff] }
  0x76   : > { %511 = vmatmul.f32.gmra.mxu1 %v282_v38  ;;  %452 = vmatmul.f32.gmra.mxu2 %v317_v39 }
  0x7c   : > { %401 = vmatmul.f32.gmra.mxu0 %v283_v40 }
  0x7d   : > { %565 = vmatmul.f32.gmra.mxu3 %v318_v41  ;;  %v312_v41 = vld [vmem:[%s1265_s13 + $0x108] sm:$0xff]  ;;  %s1044_s13 = scalar_lea.hbm %s1043_s12, 2 }
  0x7e   : > { %514 = vmatmul.f32.gmra.mxu1 %v284_v42  ;;  %455 = vmatmul.f32.gmra.mxu2 %v319_v43  ;;  %p1045_p6 = scmp.ne.s32.totalorder %s1043_s12, %s1044_s13  ;;  %p1050_p10 = scmp.lt.s32.totalorder %s1048_s19, %s1044_s13 }
  0x80   : > { %p1046_p13 = pnand %p1045_p6, %p1191_p11  ;;  %p1051_p1 = por %p1050_p10, %p1049_p9 }
  0x82   : > { %p1047_p5 = pneg %p1046_p13 }
  0x84   : > { %404 = vmatmul.f32.gmra.mxu0 %v285_v44  ;;  %p1052_p0 = pnand %p1051_p1, %p1047_p5 }
  0x85   : > { %568 = vmatmul.f32.gmra.mxu3 %v320_v45 }
  0x86   : > { %517 = vmatmul.f32.gmra.mxu1 %v286_v46  ;;  %458 = vmatmul.f32.gmra.mxu2 %v321_v47 }
  0x8c   : > { %407 = vmatmul.f32.gmra.mxu0 %v287_v48 }
  0x8d   : > { %571 = vmatmul.f32.gmra.mxu3 %v322_v49 }
  0x8e   : > { %520 = vmatmul.f32.gmra.mxu1 %v288_v50  ;;  %461 = vmatmul.f32.gmra.mxu2 %v323_v51 }
  0x94   : > { %410 = vmatmul.f32.gmra.mxu0 %v289_v52 }
  0x95   : > { %574 = vmatmul.f32.gmra.mxu3 %v324_v53 }
  0x96   : > { %523 = vmatmul.f32.gmra.mxu1 %v290_v54  ;;  %464 = vmatmul.f32.gmra.mxu2 %v325_v55 }
  0x9c   : > { %413 = vmatmul.f32.gmra.mxu0 %v291_v56 }
  0x9d   : > { %577 = vmatmul.f32.gmra.mxu3 %v326_v57 }
  0x9e   : > { %526 = vmatmul.f32.gmra.mxu1 %v292_v58  ;;  %467 = vmatmul.f32.gmra.mxu2 %v327_v59 }
  0xa4   : > { %416 = vmatmul.f32.gmra.mxu0 %v293_v60 }
  0xa5   : > { %580 = vmatmul.f32.gmra.mxu3 %v328_v61 }
  0xa6   : > { %529 = vmatmul.f32.gmra.mxu1 %v294_v62  ;;  %470 = vmatmul.f32.gmra.mxu2 %v329_v63 }
  0xac   : > { %419 = vmatmul.f32.gmra.mxu0 %v295_v0 }
  0xad   : > { %583 = vmatmul.f32.gmra.mxu3 %v330_v1 }
  0xae   : > { %532 = vmatmul.f32.gmra.mxu1 %v296_v2  ;;  %473 = vmatmul.f32.gmra.mxu2 %v331_v3 }
  0xb4   : > { %422 = vmatmul.f32.gmra.mxu0 %v297_v4 }
  0xb5   : > { %586 = vmatmul.f32.gmra.mxu3 %v332_v5 }
  0xb6   : > { %535 = vmatmul.f32.gmra.mxu1 %v298_v6  ;;  %476 = vmatmul.f32.gmra.mxu2 %v333_v7 }
  0xbc   : > { %425 = vmatmul.f32.gmra.mxu0 %v299_v8 }
  0xbd   : > { %589 = vmatmul.f32.gmra.mxu3 %v334_v9 }
  0xbe   : > { %538 = vmatmul.f32.gmra.mxu1 %v300_v10  ;;  %479 = vmatmul.f32.gmra.mxu2 %v335_v11 }
  0xc4   : > { %428 = vmatmul.f32.gmra.mxu0 %v301_v12 }
  0xc5   : > { %592 = vmatmul.f32.gmra.mxu3 %v336_v13 }
  0xc6   : > { %541 = vmatmul.f32.gmra.mxu1 %v302_v14  ;;  %482 = vmatmul.f32.gmra.mxu2 %v337_v15 }
  0xcc   : > { %431 = vmatmul.f32.gmra.mxu0 %v303_v16 }
  0xcd   : > { %595 = vmatmul.f32.gmra.mxu3 %v338_v17 }
  0xce   : > { %544 = vmatmul.f32.gmra.mxu1 %v304_v18  ;;  %485 = vmatmul.f32.gmra.mxu2 %v339_v19 }
  0xd4   : > { %434 = vmatmul.f32.gmra.mxu0 %v305_v20 }
  0xd5   : > { %598 = vmatmul.f32.gmra.mxu3 %v340_v21 }
  0xd6   : > { %547 = vmatmul.f32.gmra.mxu1 %v306_v22  ;;  %488 = vmatmul.f32.gmra.mxu2 %v341_v23 }
  0xdc   : > { %437 = vmatmul.f32.gmra.mxu0 %v307_v24 }
  0xdd   : > { %601 = vmatmul.f32.gmra.mxu3 %v342_v25 }
  0xde   : > { %550 = vmatmul.f32.gmra.mxu1 %v308_v26 }
  0xe4   : > { %440 = vmatmul.f32.gmra.mxu0 %v309_v27 }
  0xe6   : > { %553 = vmatmul.f32.gmra.mxu1 %v310_v28 }
  0xe9   : > { %v396_v30 = vpop.f32.mrf.mxu0 }
  0xea   : > { %v397_v32 = vadd.f32 %v1339_v29, %v396_v30 }
  0xeb   : > { %v509_v33 = vpop.f32.mrf.mxu1 }
  0xec   : > { %v1343_v34 = vadd.f32 %v509_v33, %v397_v32  ;;  %443 = vmatmul.f32.gmra.mxu0 %v311_v31 }
  0xee   : > { %556 = vmatmul.f32.gmra.mxu1 %v312_v41 }
  0xf0   : > { %v1345_v35 = vpop.f32.mrf.mxu3 }
  0xf1   : > { %v399_v36 = vpop.f32.mrf.mxu0  ;;  %v450_v38 = vpop.f32.mrf.mxu2 }
  0xf2   : > { %v400_v39 = vadd.f32 %v1339_v29, %v399_v36  ;;  %v451_v43 = vadd.f32 %v1339_v29, %v450_v38 }
  0xf3   : > { %v512_v40 = vpop.f32.mrf.mxu1 }
  0xf4   : > { %v1350_v42 = vadd.f32 %v512_v40, %v400_v39  ;;  %446 = vmatmul.f32.gmra.mxu0 %v313_v37 }
  0xf8   : > { %v563_v44 = vpop.f32.mrf.mxu3 }
  0xf9   : > { %v1353_v45 = vadd.f32 %v563_v44, %v451_v43  ;;  %v402_v46 = vpop.f32.mrf.mxu0  ;;  %v453_v47 = vpop.f32.mrf.mxu2 }
  0xfa   : > { %v403_v48 = vadd.f32 %v1339_v29, %v402_v46  ;;  %v454_v51 = vadd.f32 %v1339_v29, %v453_v47 }
  0xfb   : > { %v515_v49 = vpop.f32.mrf.mxu1 }
  0xfc   : > { %v1356_v50 = vadd.f32 %v515_v49, %v403_v48 }
 0x100   : > { %v566_v52 = vpop.f32.mrf.mxu3 }
 0x101   : > { %v1359_v53 = vadd.f32 %v566_v52, %v454_v51  ;;  %v405_v54 = vpop.f32.mrf.mxu0  ;;  %v456_v55 = vpop.f32.mrf.mxu2 }
 0x102   : > { %v406_v56 = vadd.f32 %v1339_v29, %v405_v54  ;;  %v457_v59 = vadd.f32 %v1339_v29, %v456_v55 }
 0x103   : > { %v518_v57 = vpop.f32.mrf.mxu1 }
 0x104   : > { %v1362_v58 = vadd.f32 %v518_v57, %v406_v56 }
 0x108   : > { %v569_v60 = vpop.f32.mrf.mxu3 }
 0x109   : > { %v1365_v61 = vadd.f32 %v569_v60, %v457_v59  ;;  %v408_v62 = vpop.f32.mrf.mxu0  ;;  %v459_v63 = vpop.f32.mrf.mxu2 }
 0x10a   : > { %v409_v0 = vadd.f32 %v1339_v29, %v408_v62  ;;  %v460_v3 = vadd.f32 %v1339_v29, %v459_v63 }
 0x10b   : > { %v521_v1 = vpop.f32.mrf.mxu1 }
 0x10c   : > { %v1368_v2 = vadd.f32 %v521_v1, %v409_v0 }
 0x110   : > { %v572_v4 = vpop.f32.mrf.mxu3 }
 0x111   : > { %v1371_v5 = vadd.f32 %v572_v4, %v460_v3  ;;  %v411_v6 = vpop.f32.mrf.mxu0  ;;  %v462_v7 = vpop.f32.mrf.mxu2 }
 0x112   : > { %v412_v8 = vadd.f32 %v1339_v29, %v411_v6  ;;  %v463_v11 = vadd.f32 %v1339_v29, %v462_v7 }
 0x113   : > { %v524_v9 = vpop.f32.mrf.mxu1 }
 0x114   : > { %v1374_v10 = vadd.f32 %v524_v9, %v412_v8 }
 0x118   : > { %v575_v12 = vpop.f32.mrf.mxu3 }
 0x119   : > { %v1377_v13 = vadd.f32 %v575_v12, %v463_v11  ;;  %v414_v14 = vpop.f32.mrf.mxu0  ;;  %v465_v15 = vpop.f32.mrf.mxu2 }
 0x11a   : > { %v415_v16 = vadd.f32 %v1339_v29, %v414_v14  ;;  %v466_v19 = vadd.f32 %v1339_v29, %v465_v15 }
 0x11b   : > { %v527_v17 = vpop.f32.mrf.mxu1 }
 0x11c   : > { %v1380_v18 = vadd.f32 %v527_v17, %v415_v16 }
 0x120   : > { %v578_v20 = vpop.f32.mrf.mxu3 }
 0x121   : > { %v1383_v21 = vadd.f32 %v578_v20, %v466_v19  ;;  %v417_v22 = vpop.f32.mrf.mxu0  ;;  %v468_v23 = vpop.f32.mrf.mxu2 }
 0x122   : > { %v418_v24 = vadd.f32 %v1339_v29, %v417_v22  ;;  %v469_v27 = vadd.f32 %v1339_v29, %v468_v23 }
 0x123   : > { %v530_v25 = vpop.f32.mrf.mxu1 }
 0x124   : > { %v1386_v26 = vadd.f32 %v530_v25, %v418_v24 }
 0x128   : > { %v581_v28 = vpop.f32.mrf.mxu3 }
 0x129   : > { %v1389_v30 = vadd.f32 %v581_v28, %v469_v27  ;;  %v420_v31 = vpop.f32.mrf.mxu0  ;;  %v471_v32 = vpop.f32.mrf.mxu2 }
 0x12a   : > { %v421_v33 = vadd.f32 %v1339_v29, %v420_v31  ;;  %v472_v38 = vadd.f32 %v1339_v29, %v471_v32 }
 0x12b   : > { %v533_v36 = vpop.f32.mrf.mxu1 }
 0x12c   : > { %v1392_v37 = vadd.f32 %v533_v36, %v421_v33 }
 0x130   : > { %v584_v39 = vpop.f32.mrf.mxu3 }
 0x131   : > { %v1395_v40 = vadd.f32 %v584_v39, %v472_v38  ;;  %v423_v41 = vpop.f32.mrf.mxu0  ;;  %v474_v43 = vpop.f32.mrf.mxu2 }
 0x132   : > { %v424_v44 = vadd.f32 %v1339_v29, %v423_v41 }
 0x133   : > { %v536_v46 = vpop.f32.mrf.mxu1 }
 0x134   : > { %v1398_v47 = vadd.f32 %v536_v46, %v424_v44 }
 0x138   : > { %v587_v48 = vpop.f32.mrf.mxu3 }
 0x139   : > { %v426_v49 = vpop.f32.mrf.mxu0  ;;  %v477_v51 = vpop.f32.mrf.mxu2 }
 0x13a   : > { %v478_v38 = vadd.f32 %v1339_v29, %v477_v51  ;;  %v427_v51 = vadd.f32 %v1339_v29, %v426_v49  ;;  %v628_v49 = vmax.f32 %v1383_v21, 0.0  ;;  %v610_v21 = vmax.f32 %v1374_v10, 0.0 }
 0x13b   : > { %v539_v52 = vpop.f32.mrf.mxu1 }
 0x140   : > { %v590_v54 = vpop.f32.mrf.mxu3 }
 0x141   : > { %v429_v55 = vpop.f32.mrf.mxu0  ;;  %v480_v56 = vpop.f32.mrf.mxu2 }
 0x142   : > { %v481_v27 = vadd.f32 %v1339_v29, %v480_v56  ;;  %v475_v56 = vadd.f32 %v1339_v29, %v474_v43  ;;  %v630_v43 = vmax.f32 %v1395_v40, 0.0  ;;  %v612_v40 = vmax.f32 %v1386_v26, 0.0 }
 0x143   : > { %v542_v57 = vpop.f32.mrf.mxu1 }
 0x148   : > { %v593_v59 = vpop.f32.mrf.mxu3 }
 0x149   : > { %v432_v60 = vpop.f32.mrf.mxu0  ;;  %v483_v62 = vpop.f32.mrf.mxu2  ;;  %v594_v39 = vadd.f32 %v593_v59, %v481_v27  ;;  %v719_v27 = vlaneseq }
 0x14a   : > { %v484_v16 = vadd.f32 %v1339_v29, %v483_v62  ;;  %v433_v41 = vadd.f32 %v1339_v29, %v432_v60 }
 0x14b   : > { %v545_v63 = vpop.f32.mrf.mxu1  ;;  %vm737_vm11 = vcmp.lt.s32.totalorder %v719_v27, 256 }
 0x150   : > { %v596_v0 = vpop.f32.mrf.mxu3 }
 0x151   : > { %v435_v1 = vpop.f32.mrf.mxu0  ;;  %v486_v3 = vpop.f32.mrf.mxu2  ;;  %v597_v28 = vadd.f32 %v596_v0, %v484_v16  ;;  %v591_v0 = vadd.f32 %v590_v54, %v478_v38  ;;  %v722_v38 = vstv %s855_s15 }
 0x152   : > { %v487_v12 = vadd.f32 %v1339_v29, %v486_v3  ;;  %v436_v31 = vadd.f32 %v1339_v29, %v435_v1  ;;  %v430_v1 = vadd.f32 %v1339_v29, %v429_v55  ;;  %v633_v3 = vmax.f32 %v594_v39, 0.0 }
 0x153   : > { %v548_v4 = vpop.f32.mrf.mxu1  ;;  %v634_v44 = vmax.f32 %v597_v28, 0.0  ;;  %v632_v59 = vmax.f32 %v591_v0, 0.0  ;;  %v629_v55 = vmax.f32 %v1389_v30, 0.0  ;;  %v611_v30 = vmax.f32 %v1380_v18, 0.0 }
 0x154   : > { %v549_v46 = vadd.f32 %v548_v4, %v436_v31  ;;  %v543_v60 = vadd.f32 %v542_v57, %v430_v1  ;;  %v613_v57 = vmax.f32 %v1392_v37, 0.0  ;;  %v608_v18 = vmax.f32 %v1362_v58, 0.0 }
 0x158   : > { %v599_v6 = vpop.f32.mrf.mxu3 }
 0x159   : > { %v438_v7 = vpop.f32.mrf.mxu0  ;;  %v489_v8 = vpop.f32.mrf.mxu2  ;;  %v600_v19 = vadd.f32 %v599_v6, %v487_v12  ;;  %v546_v6 = vadd.f32 %v545_v63, %v433_v41  ;;  %v616_v12 = vmax.f32 %v543_v60, 0.0  ;;  %v627_v63 = vmax.f32 %v1377_v13, 0.0 }
 0x15a   : > { %v490_v11 = vadd.f32 %v1339_v29, %v489_v8  ;;  %v439_v20 = vadd.f32 %v1339_v29, %v438_v7  ;;  %v618_v7 = vmax.f32 %v549_v46, 0.0  ;;  %v588_v8 = vadd.f32 %v587_v48, %v475_v56 }
 0x15b   : > { %v551_v9 = vpop.f32.mrf.mxu1  ;;  %v635_v32 = vmax.f32 %v600_v19, 0.0  ;;  %v614_v48 = vmax.f32 %v1398_v47, 0.0  ;;  %v625_v47 = vmax.f32 %v1365_v61, 0.0  ;;  %v609_v13 = vmax.f32 %v1368_v2, 0.0 }
 0x15c   : > { %v552_v33 = vadd.f32 %v551_v9, %v439_v20  ;;  %v617_v9 = vmax.f32 %v546_v6, 0.0  ;;  %v631_v4 = vmax.f32 %v588_v8, 0.0  ;;  %v606_v2 = vmax.f32 %v1350_v42, 0.0 }
 0x15e   : > { %v619_v62 = vmax.f32 %v552_v33, 0.0 }
 0x160   : > { %v602_v14 = vpop.f32.mrf.mxu3 }
 0x161   : > { %v603_v15 = vadd.f32 %v602_v14, %v490_v11  ;;  %v441_v17 = vpop.f32.mrf.mxu0  ;;  %v540_v11 = vadd.f32 %v539_v52, %v427_v51  ;;  %v626_v14 = vmax.f32 %v1371_v5, 0.0  ;;  %v623_v5 = vmax.f32 %v1353_v45, 0.0 }
 0x162   : > { %v442_v23 = vadd.f32 %v1339_v29, %v441_v17  ;;  %v607_v17 = vmax.f32 %v1356_v50, 0.0  ;;  %v639_v45 = vstv %s638_s29 }
 0x163   : > { %v636_v22 = vmax.f32 %v603_v15, 0.0  ;;  %v554_v24 = vpop.f32.mrf.mxu1  ;;  %v615_v54 = vmax.f32 %v540_v11, 0.0  ;;  %v624_v15 = vmax.f32 %v1359_v53, 0.0 }
 0x164   : > { %v555_v25 = vadd.f32 %v554_v24, %v442_v23 }
 0x165   : > { %660 = vmatpush.xpose.msrb.mxu3 %v636_v22 }
 0x166   : > { %v620_v36 = vmax.f32 %v555_v25, 0.0 }
 0x168   : > { %640 = vmatpush.xpose.msrb.mxu2 %v620_v36 }
 0x169   : > { %661 = vmatpush.xpose.msrb.mxu3 %v635_v32  ;;  %v444_v52 = vpop.f32.mrf.mxu0 }
 0x16a   : > { %v445_v16 = vadd.f32 %v1339_v29, %v444_v52 }
 0x16b   : > { %v557_v10 = vpop.f32.mrf.mxu1 }
 0x16c   : > { %641 = vmatpush.xpose.msrb.mxu2 %v619_v62  ;;  %v558_v19 = vadd.f32 %v557_v10, %v445_v16 }
 0x16d   : > { %662 = vmatpush.xpose.msrb.mxu3 %v634_v44 }
 0x16e   : > { %v621_v20 = vmax.f32 %v558_v19, 0.0 }
 0x170   : > { %642 = vmatpush.xpose.msrb.mxu2 %v618_v7 }
 0x171   : > { %663 = vmatpush.xpose.msrb.mxu3 %v633_v3  ;;  %v447_v37 = vpop.f32.mrf.mxu0 }
 0x172   : > { %v448_v26 = vadd.f32 %v1339_v29, %v447_v37  ;;  %v637_v29 = vld [vmem:[%s1473_s3] sm:$0x1] }
 0x174   : > { %643 = vmatpush.xpose.msrb.mxu2 %v617_v9  ;;  %v561_v61 = vadd.f32 %v1345_v35, %v448_v26  ;;  %v605_v35 = vmax.f32 %v1343_v34, 0.0  ;;  %v720_v34 = vand.u32 127, %v719_v27 }
 0x175   : > { %664 = vmatpush.xpose.msrb.mxu3 %v632_v59 }
 0x176   : > { %v622_v53 = vmax.f32 %v561_v61, 0.0  ;;  %v721_v33 = vadd.s32 128, %v720_v34  ;;  %v723_v51 = vadd.s32 %v722_v38, %v720_v34 }
 0x178   : > { %644 = vmatpush.xpose.msrb.mxu2 %v616_v12  ;;  %v724_v44 = vadd.s32 %v722_v38, %v721_v33  ;;  %vm725_vm8 = vcmp.lt.s32.totalorder %v723_v51, 1000 }
 0x179   : > { %665 = vmatpush.xpose.msrb.mxu3 %v631_v4 }
 0x17a   : > { %vm726_vm2 = vcmp.lt.s32.totalorder %v724_v44, 1000 }
 0x17c   : > { %645 = vmatpush.xpose.msrb.mxu2 %v615_v54 }
 0x17d   : > { %666 = vmatpush.xpose.msrb.mxu3 %v630_v43 }
 0x180   : > { %646 = vmatpush.xpose.msrb.mxu2 %v614_v48 }
 0x181   : > { %667 = vmatpush.xpose.msrb.mxu3 %v629_v55 }
 0x184   : > { %647 = vmatpush.xpose.msrb.mxu2 %v613_v57 }
 0x185   : > { %668 = vmatpush.xpose.msrb.mxu3 %v628_v49 }
 0x188   : > { %648 = vmatpush.xpose.msrb.mxu2 %v612_v40 }
 0x189   : > { %669 = vmatpush.xpose.msrb.mxu3 %v627_v63 }
 0x18c   : > { %649 = vmatpush.xpose.msrb.mxu2 %v611_v30 }
 0x18d   : > { %670 = vmatpush.xpose.msrb.mxu3 %v626_v14 }
 0x190   : > { %650 = vmatpush.xpose.msrb.mxu2 %v610_v21 }
 0x191   : > { %671 = vmatpush.xpose.msrb.mxu3 %v625_v47 }
 0x194   : > { %651 = vmatpush.xpose.msrb.mxu2 %v609_v13 }
 0x195   : > { %672 = vmatpush.xpose.msrb.mxu3 %v624_v15 }
 0x198   : > { %652 = vmatpush.xpose.msrb.mxu2 %v608_v18 }
 0x199   : > { %673 = vmatpush.xpose.msrb.mxu3 %v623_v5 }
 0x19c   : > { %653 = vmatpush.xpose.msrb.mxu2 %v607_v17 }
 0x19d   : > { %674 = vmatpush.xpose.msrb.mxu3 %v622_v53 }
 0x1a0   : > { %654 = vmatpush.xpose.msrb.mxu2 %v606_v2 }
 0x1a1   : > { %675 = vmatpush.xpose.msrb.mxu3 %v621_v20 }
 0x1a4   : > { %676 = vmatmul.f32.vlgmr.msrb.gmra.mxu3 %v637_v29  ;;  %655 = vmatpush.xpose.msrb.mxu2 %v605_v35 }
 0x1a7   : > { %656 = vmatmul.f32.vlgmr.msrb.gmra.mxu2 %v637_v29 }
 0x227   : > { %v677_v50 = vpop.f32.mrf.mxu3 }
 0x228   : > { %v678_v58 = vadd.f32 %v677_v50, %v639_v45 }
 0x22a   : > { %v854_v22 = vmul.f32 -1.442695, %v678_v58  ;;  %v657_v23 = vpop.f32.mrf.mxu2 }
 0x22b   : > { %v658_v42 = vadd.f32 %v657_v23, %v639_v45 }
 0x22c   : > { %951 = vpow2.f32 %v854_v22 }
 0x22d   : > { %v853_v24 = vmul.f32 -1.442695, %v658_v42 }
 0x22f   : > { %953 = vpow2.f32 %v853_v24 }
 0x232   : > { %v952_v25 = vpop.eup %951 }
 0x233   : > { %v687_v28 = vadd.f32 1.0, %v952_v25 }
 0x235   : > { %955 = vrcp.f32 %v687_v28  ;;  %v954_v31 = vpop.eup %953  ;;  %v712_v62 = vand.u32 2147483647, %v687_v28  ;;  %v714_v56 = vand.u32 2147483648, %v687_v28  ;;  %vm708_vm1 = vweird.f32 %v687_v28 }
 0x236   : > { %v686_v32 = vadd.f32 1.0, %v954_v31 }
 0x237   : > { %vm713_vm4 = vcmp.eq.f32.partialorder %v712_v62, 8.507059e+37  ;;  %v715_v7 = vor.u32 1.1754944e-38, %v714_v56 }
 0x238   : > { %957 = vrcp.f32 %v686_v32  ;;  %v699_v8 = vand.u32 2147483648, %v686_v32  ;;  %v697_v60 = vand.u32 2147483647, %v686_v32  ;;  %vm693_vm6 = vweird.f32 %v686_v32 }
 0x23a   : > { %v700_v43 = vor.u32 1.1754944e-38, %v699_v8  ;;  %vm698_vm9 = vcmp.eq.f32.partialorder %v697_v60, 8.507059e+37 }
 0x23b   : > { %v956_v36 = vpop.eup %955 }
 0x23c   : > { %v704_v39 = vmul.f32 %v956_v36, %v687_v28  ;;  %vm709_vm0 = vweird.f32 %v956_v36 }
 0x23d   : > { %vm710_vm3 = vmor %vm708_vm1, %vm709_vm0 }
 0x23e   : > { %v705_v41 = vsub.f32 1.0, %v704_v39  ;;  %v958_v46 = vpop.eup %957 }
 0x23f   : > { %v689_v1 = vmul.f32 %v958_v46, %v686_v32  ;;  %vm694_vm5 = vweird.f32 %v958_v46 }
 0x240   : > { %v706_v0 = vmul.f32 %v956_v36, %v705_v41  ;;  %vm695_vm7 = vmor %vm693_vm6, %vm694_vm5 }
 0x241   : > { %v690_v6 = vsub.f32 1.0, %v689_v1 }
 0x242   : > { %v707_v3 = vadd.f32 %v956_v36, %v706_v0 }
 0x243   : > { %v691_v59 = vmul.f32 %v958_v46, %v690_v6 }
 0x244   : > { %v711_v9 = vsel %vm710_vm3, %v956_v36, %v707_v3 }
 0x245   : > { %v716_v4 = vsel %vm713_vm4, %v715_v7, %v711_v9  ;;  %v692_v11 = vadd.f32 %v958_v46, %v691_v59 }
 0x246   : > { %v728_v12 = vsel %vm726_vm2, %v716_v4, 0.0 }
 0x247   : > { %v696_v54 = vsel %vm695_vm7, %v958_v46, %v692_v11  ;;  %v731_v48 = vrot.slane %v728_v12, 7 }
 0x248   : > { %v701_v55 = vsel %vm698_vm9, %v700_v43, %v696_v54 }
 0x249   : > { %v727_v49 = vsel %vm725_vm8, %v701_v55, 0.0 }
 0x24a   : > { %v733_v57 = vsel %vm732_vm10, %v727_v49, %v731_v48 }
 0x24b   : > { %739 = vst.msk [vmem:[%s271_s4] sm:$0x3] %vm737_vm11, %v733_v57 }
 0x24c   : > { %1055 = shalt.err (!%p1052_p0)
}
 0x24d   : > { %900 = dma.vmem_to_hbm [thread:$0]  (%p1191_p11), %s754_s26, 32, %s756_s10, %s741_s24  }
 0x24e PF: > { %p912_p2 = scmp.ge.s32.totalorder %s1098_s23, 2  ;;  %s767_s17 = sand.u32 1, %s1086_s20  }
 0x24f   : > { %p1487_p3 = scmp.ne.s32.totalorder %s1481_s7, 0  ;;  %s768_s15 = scalar_lea.sflag [#allocation5], %s767_s17 }
 0x251   : > { %p907_p7 = pnand %p912_p2, %p1487_p3 }
 0x253   : > { %p908_p8 = pneg %p907_p7 }
 0x255   : > { %1081 = dma.done.wait (%p908_p8), %s768_s15, 32  }
 0x256   : > { %1083 = vsyncadd (%p908_p8), %s768_s15, 4294967264  ;;  %p20_p4 = scmp.ge.s32.totalorder %s1164_s25, 6   ;;  %s1488_s20 = smov %s1090_s21 }
 0x257   : > { %s1489_s21 = smov %s1094_s22  ;;  %s1490_s22 = smov %s1176_s28 }
 0x258   : > { %s1491_s23 = smov %s1164_s25  ;;  %22 = sbr.rel (!%p20_p4) target bundleno = 8 (0x8), region = 89 }
 0x25d   :  { %774 = vsyncpa [#allocation4], 1 }
 0x25e   :  { %776 = vsyncpa [#allocation4 + $0x1], 1 }
 0x25f   :  { %777 = vsyncpa [#allocation7], 1 }
 0x260   :  { %778 = vsyncpa [#allocation5], 1 }
 0x261   :  { %780 = vsyncpa [#allocation5 + $0x1], 1 }

</bundles_post_ra>
